<compile_context>
chip_gen: v6e
topology: v6e:2x2x1
jax: 0.10.0
libtpu: 0.0.40
codegen_flags: <defaults>
</compile_context>

<pallas_src>
import functools

import jax
import jax.numpy as jnp
from jax.experimental import pallas as pl
from jax.experimental.pallas import tpu as pltpu


# Packed-parameter layout (all float32, flattened):
#   [0:24)   w1     (8 out, 3 in)  -> idx = c*3 + k
#   [24:32)  b1     (8,)
#   [32:64)  w_fold (4 out, 8 in)  -> idx = 32 + c*8 + k   (conv2 ∘ conv_transpose)
#   [64:68)  b_fold (4,)
_CIN, _C1, _C2, _COUT = 3, 8, 16, 4
_OFF_W1, _OFF_B1 = 0, 24
_OFF_WF, _OFF_BF = 32, 64
_N_PARAMS = 68


def _fused_kernel(p_ref, x_ref, o_ref, *, min_value, max_value):
    # p_ref: (68,) float32 scalar weight table in SMEM.
    # x_ref: (3, S, 128) lane- and sublane-dense pixel tile.
    # o_ref: (4, S, 128).
    x = [x_ref[k] for k in range(_CIN)]                    # each (S, 128)

    inv_sqrt2 = jnp.float32(0.7071067811865476)

    # conv1 (1x1, 3->8) as scalar-weight FMAs on full (S,128) tiles,
    # immediately followed by exact (erf) GELU (erf runs on the EUP slot).
    g = []
    for c in range(_C1):
        acc = x[0] * p_ref[_OFF_W1 + c * _CIN + 0]
        acc = acc + x[1] * p_ref[_OFF_W1 + c * _CIN + 1]
        acc = acc + x[2] * p_ref[_OFF_W1 + c * _CIN + 2]
        acc = acc + p_ref[_OFF_B1 + c]
        g.append(0.5 * acc * (1.0 + jax.lax.erf(acc * inv_sqrt2)))

    # Folded conv2∘conv_transpose (8->4), clamp, per-channel unmasked store.
    for c in range(_COUT):
        acc = g[0] * p_ref[_OFF_WF + c * _C1 + 0]
        for k in range(1, _C1):
            acc = acc + g[k] * p_ref[_OFF_WF + c * _C1 + k]
        acc = acc + p_ref[_OFF_BF + c]
        acc = jnp.maximum(acc, jnp.float32(min_value))
        acc = jnp.minimum(acc, jnp.float32(max_value))
        o_ref[c] = acc                                     # full (S,128) vst


def _pick_tile(hw128, cap=512):
    """Largest sublane-block size <= cap that tiles hw128 cleanly."""
    if hw128 <= cap:
        return hw128                       # full extent is always a legal block
    s = (cap // 8) * 8
    while s >= 8:
        if hw128 % s == 0:
            return s
        s -= 8
    return hw128                           # fallback: single big block


def fused_forward(x_nchw, params, *, min_value=5.0, max_value=5.0, tile_cap=512):
    """x_nchw: (N, 3, H, W) float32.  Returns (N, 4, H, W) float32."""
    w1, b1, w2, b2, wt, bt = params        # torch layouts (see init_params)
    N, Cin, H, W = x_nchw.shape
    assert Cin == _CIN
    HW = H * W

    # clamp_min(min) then clamp_max(max) with min >= max is the constant max
    # (the module's default min=max=5): pure fill, no kernel launch needed.
    if float(min_value) >= float(max_value):
        return jnp.full((N, _COUT, H, W), jnp.float32(max_value), jnp.float32)

    # TODO(synk): H*W not divisible by 128 would need a masked remainder path.
    assert HW % 128 == 0, "H*W must be a multiple of 128"
    hw128 = HW // 128
    s = _pick_tile(hw128, tile_cap)

    # Contiguous reshape only (no transpose): NCHW -> (N, C, HW/128, 128).
    x4 = x_nchw.reshape(N, Cin, hw128, 128)

    # Fold conv2 and conv_transpose (both 1x1, no nonlinearity in between).
    # ConvTranspose2d weight is (in, out) -> effective (out, in) is wt.T.
    wt_eff = wt.T                                   # (4, 16)
    w_fold = wt_eff @ w2                            # (4, 8)
    b_fold = wt_eff @ b2 + bt                       # (4,)

    packed = jnp.concatenate([
        w1.reshape(-1), b1.reshape(-1),
        w_fold.reshape(-1), b_fold.reshape(-1),
    ]).astype(jnp.float32)
    assert packed.shape[0] == _N_PARAMS

    kernel = functools.partial(_fused_kernel,
                               min_value=min_value, max_value=max_value)

    out4 = pl.pallas_call(
        kernel,
        out_shape=jax.ShapeDtypeStruct((N, _COUT, hw128, 128), jnp.float32),
        grid_spec=pltpu.PrefetchScalarGridSpec(
            num_scalar_prefetch=0,
            grid=(N, hw128 // s),
            in_specs=[
                # Scalar weight table resident in SMEM for the whole grid.
                pl.BlockSpec(memory_space=pltpu.MemorySpace.SMEM),
                pl.BlockSpec((None, Cin, s, 128), lambda n, t: (n, 0, t, 0)),
            ],
            out_specs=pl.BlockSpec((None, _COUT, s, 128), lambda n, t: (n, 0, t, 0)),
        ),
        compiler_params=pltpu.CompilerParams(
            dimension_semantics=("parallel", "parallel")),
    )(packed, x4)

    return out4.reshape(N, _COUT, H, W)


def init_params(key):
    """Deterministic params in PyTorch layouts:
       conv1 w (8,3), b (8,); conv2 w (16,8), b (16,);
       conv_transpose w (16,4) [in,out], b (4,)."""
    k1, k2, k3, k4, k5, k6 = jax.random.split(key, 6)
    w1 = jax.random.normal(k1, (_C1, _CIN), jnp.float32) * 0.5
    b1 = jax.random.normal(k2, (_C1,), jnp.float32) * 0.1
    w2 = jax.random.normal(k3, (_C2, _C1), jnp.float32) * 0.3
    b2 = jax.random.normal(k4, (_C2,), jnp.float32) * 0.1
    wt = jax.random.normal(k5, (_C2, _COUT), jnp.float32) * 0.3
    bt = jax.random.normal(k6, (_COUT,), jnp.float32) * 0.1
    return w1, b1, w2, b2, wt, bt


def reference_forward(x_nchw, params, min_value=5.0, max_value=5.0):
    """Pure-JAX reference (unfolded, NCHW) for correctness checking."""
    w1, b1, w2, b2, wt, bt = params
    v1 = jnp.einsum('nchw,oc->nohw', x_nchw, w1) + b1[None, :, None, None]
    v2 = 0.5 * v1 * (1.0 + jax.lax.erf(v1 / jnp.sqrt(2.0)))
    v3 = jnp.einsum('nchw,oc->nohw', v2, w2) + b2[None, :, None, None]
    v4 = jnp.einsum('nchw,co->nohw', v3, wt) + bt[None, :, None, None]
    return jnp.minimum(jnp.maximum(v4, min_value), max_value)


if __name__ == "__main__":
    key = jax.random.PRNGKey(0)
    kx, kp = jax.random.split(key)

    # Small input consistent with the module (Cin=3): N=2, H=W=32 (HW=1024).
    x = jax.random.normal(kx, (2, 3, 32, 32), jnp.float32)
    params = init_params(kp)

    # 1) Non-degenerate clamps: exercises the full conv/GELU/folded chain in
    #    the Pallas kernel (with min=max the output would be constant).
    out = jax.block_until_ready(fused_forward(x, params, min_value=-1.0, max_value=2.0))
    ref = reference_forward(x, params, -1.0, 2.0)
    assert out.shape == (2, 4, 32, 32), out.shape
    assert jnp.allclose(out, ref, atol=1e-4, rtol=1e-4), "mismatch vs reference (wide clamps)"

    # 2) Module-default semantics (min=max=5 -> constant 5 everywhere):
    #    wrapper short-circuits to a constant fill.
    out_d = jax.block_until_ready(fused_forward(x, params, min_value=5.0, max_value=5.0))
    ref_d = reference_forward(x, params, 5.0, 5.0)
    assert jnp.allclose(out_d, ref_d, atol=1e-5, rtol=1e-5), "mismatch vs reference (default clamps)"

    print("KERNEL_OK")
</pallas_src>

<mosaic_0001>
module attributes {stable_mosaic.version = 11 : i64} {
  func.func @_fused_kernel(%arg0: i32, %arg1: i32, %arg2: memref<68xf32, #tpu.memory_space<smem>>, %arg3: memref<1x3x8x128xf32, #tpu.memory_space<vmem>>, %arg4: memref<1x4x8x128xf32, #tpu.memory_space<vmem>>) attributes {dimension_semantics = [#tpu.dimension_semantics<parallel>, #tpu.dimension_semantics<parallel>], iteration_bounds = array<i64: 2, 1>, scalar_prefetch = 0 : i64, scratch_operands = 0 : i64, tpu.core_type = #tpu.core_type<tc>, window_params = [{transform_indices = @transform_0, window_bounds = array<i64: 68>}, {transform_indices = @transform_1, window_bounds = array<i64: 1, 3, 8, 128>}, {transform_indices = @transform_2, window_bounds = array<i64: 1, 4, 8, 128>}]} {
    %c0 = arith.constant 0 : index
    %c0_0 = arith.constant 0 : index
    %c0_1 = arith.constant 0 : index
    %c0_2 = arith.constant 0 : index
    %0 = vector.load %arg3[%c0, %c0_0, %c0_1, %c0_2] : memref<1x3x8x128xf32, #tpu.memory_space<vmem>>, vector<1x1x8x128xf32>
    %1 = vector.shape_cast %0 : vector<1x1x8x128xf32> to vector<8x128xf32>
    %c0_3 = arith.constant 0 : index
    %c1 = arith.constant 1 : index
    %c0_4 = arith.constant 0 : index
    %c0_5 = arith.constant 0 : index
    %2 = vector.load %arg3[%c0_3, %c1, %c0_4, %c0_5] : memref<1x3x8x128xf32, #tpu.memory_space<vmem>>, vector<1x1x8x128xf32>
    %3 = vector.shape_cast %2 : vector<1x1x8x128xf32> to vector<8x128xf32>
    %c0_6 = arith.constant 0 : index
    %c2 = arith.constant 2 : index
    %c0_7 = arith.constant 0 : index
    %c0_8 = arith.constant 0 : index
    %4 = vector.load %arg3[%c0_6, %c2, %c0_7, %c0_8] : memref<1x3x8x128xf32, #tpu.memory_space<vmem>>, vector<1x1x8x128xf32>
    %5 = vector.shape_cast %4 : vector<1x1x8x128xf32> to vector<8x128xf32>
    %c0_9 = arith.constant 0 : index
    %6 = memref.load %arg2[%c0_9] : memref<68xf32, #tpu.memory_space<smem>>
    %7 = vector.broadcast %6 : f32 to vector<8x128xf32>
    %8 = arith.mulf %1, %7 : vector<8x128xf32>
    %c1_10 = arith.constant 1 : index
    %9 = memref.load %arg2[%c1_10] : memref<68xf32, #tpu.memory_space<smem>>
    %10 = vector.broadcast %9 : f32 to vector<8x128xf32>
    %11 = arith.mulf %3, %10 : vector<8x128xf32>
    %12 = arith.addf %8, %11 : vector<8x128xf32>
    %c2_11 = arith.constant 2 : index
    %13 = memref.load %arg2[%c2_11] : memref<68xf32, #tpu.memory_space<smem>>
    %14 = vector.broadcast %13 : f32 to vector<8x128xf32>
    %15 = arith.mulf %5, %14 : vector<8x128xf32>
    %16 = arith.addf %12, %15 : vector<8x128xf32>
    %c24 = arith.constant 24 : index
    %17 = memref.load %arg2[%c24] : memref<68xf32, #tpu.memory_space<smem>>
    %18 = vector.broadcast %17 : f32 to vector<8x128xf32>
    %19 = arith.addf %16, %18 : vector<8x128xf32>
    %cst = arith.constant 5.000000e-01 : f32
    %20 = vector.broadcast %cst : f32 to vector<8x128xf32>
    %21 = arith.mulf %20, %19 : vector<8x128xf32>
    %cst_12 = arith.constant 0.707106769 : f32
    %22 = vector.broadcast %cst_12 : f32 to vector<8x128xf32>
    %23 = arith.mulf %19, %22 : vector<8x128xf32>
    %24 = math.erf %23 : vector<8x128xf32>
    %cst_13 = arith.constant 1.000000e+00 : f32
    %25 = vector.broadcast %cst_13 : f32 to vector<8x128xf32>
    %26 = arith.addf %25, %24 : vector<8x128xf32>
    %27 = arith.mulf %21, %26 : vector<8x128xf32>
    %c3 = arith.constant 3 : index
    %28 = memref.load %arg2[%c3] : memref<68xf32, #tpu.memory_space<smem>>
    %29 = vector.broadcast %28 : f32 to vector<8x128xf32>
    %30 = arith.mulf %1, %29 : vector<8x128xf32>
    %c4 = arith.constant 4 : index
    %31 = memref.load %arg2[%c4] : memref<68xf32, #tpu.memory_space<smem>>
    %32 = vector.broadcast %31 : f32 to vector<8x128xf32>
    %33 = arith.mulf %3, %32 : vector<8x128xf32>
    %34 = arith.addf %30, %33 : vector<8x128xf32>
    %c5 = arith.constant 5 : index
    %35 = memref.load %arg2[%c5] : memref<68xf32, #tpu.memory_space<smem>>
    %36 = vector.broadcast %35 : f32 to vector<8x128xf32>
    %37 = arith.mulf %5, %36 : vector<8x128xf32>
    %38 = arith.addf %34, %37 : vector<8x128xf32>
    %c25 = arith.constant 25 : index
    %39 = memref.load %arg2[%c25] : memref<68xf32, #tpu.memory_space<smem>>
    %40 = vector.broadcast %39 : f32 to vector<8x128xf32>
    %41 = arith.addf %38, %40 : vector<8x128xf32>
    %cst_14 = arith.constant 5.000000e-01 : f32
    %42 = vector.broadcast %cst_14 : f32 to vector<8x128xf32>
    %43 = arith.mulf %42, %41 : vector<8x128xf32>
    %cst_15 = arith.constant 0.707106769 : f32
    %44 = vector.broadcast %cst_15 : f32 to vector<8x128xf32>
    %45 = arith.mulf %41, %44 : vector<8x128xf32>
    %46 = math.erf %45 : vector<8x128xf32>
    %cst_16 = arith.constant 1.000000e+00 : f32
    %47 = vector.broadcast %cst_16 : f32 to vector<8x128xf32>
    %48 = arith.addf %47, %46 : vector<8x128xf32>
    %49 = arith.mulf %43, %48 : vector<8x128xf32>
    %c6 = arith.constant 6 : index
    %50 = memref.load %arg2[%c6] : memref<68xf32, #tpu.memory_space<smem>>
    %51 = vector.broadcast %50 : f32 to vector<8x128xf32>
    %52 = arith.mulf %1, %51 : vector<8x128xf32>
    %c7 = arith.constant 7 : index
    %53 = memref.load %arg2[%c7] : memref<68xf32, #tpu.memory_space<smem>>
    %54 = vector.broadcast %53 : f32 to vector<8x128xf32>
    %55 = arith.mulf %3, %54 : vector<8x128xf32>
    %56 = arith.addf %52, %55 : vector<8x128xf32>
    %c8 = arith.constant 8 : index
    %57 = memref.load %arg2[%c8] : memref<68xf32, #tpu.memory_space<smem>>
    %58 = vector.broadcast %57 : f32 to vector<8x128xf32>
    %59 = arith.mulf %5, %58 : vector<8x128xf32>
    %60 = arith.addf %56, %59 : vector<8x128xf32>
    %c26 = arith.constant 26 : index
    %61 = memref.load %arg2[%c26] : memref<68xf32, #tpu.memory_space<smem>>
    %62 = vector.broadcast %61 : f32 to vector<8x128xf32>
    %63 = arith.addf %60, %62 : vector<8x128xf32>
    %cst_17 = arith.constant 5.000000e-01 : f32
    %64 = vector.broadcast %cst_17 : f32 to vector<8x128xf32>
    %65 = arith.mulf %64, %63 : vector<8x128xf32>
    %cst_18 = arith.constant 0.707106769 : f32
    %66 = vector.broadcast %cst_18 : f32 to vector<8x128xf32>
    %67 = arith.mulf %63, %66 : vector<8x128xf32>
    %68 = math.erf %67 : vector<8x128xf32>
    %cst_19 = arith.constant 1.000000e+00 : f32
    %69 = vector.broadcast %cst_19 : f32 to vector<8x128xf32>
    %70 = arith.addf %69, %68 : vector<8x128xf32>
    %71 = arith.mulf %65, %70 : vector<8x128xf32>
    %c9 = arith.constant 9 : index
    %72 = memref.load %arg2[%c9] : memref<68xf32, #tpu.memory_space<smem>>
    %73 = vector.broadcast %72 : f32 to vector<8x128xf32>
    %74 = arith.mulf %1, %73 : vector<8x128xf32>
    %c10 = arith.constant 10 : index
    %75 = memref.load %arg2[%c10] : memref<68xf32, #tpu.memory_space<smem>>
    %76 = vector.broadcast %75 : f32 to vector<8x128xf32>
    %77 = arith.mulf %3, %76 : vector<8x128xf32>
    %78 = arith.addf %74, %77 : vector<8x128xf32>
    %c11 = arith.constant 11 : index
    %79 = memref.load %arg2[%c11] : memref<68xf32, #tpu.memory_space<smem>>
    %80 = vector.broadcast %79 : f32 to vector<8x128xf32>
    %81 = arith.mulf %5, %80 : vector<8x128xf32>
    %82 = arith.addf %78, %81 : vector<8x128xf32>
    %c27 = arith.constant 27 : index
    %83 = memref.load %arg2[%c27] : memref<68xf32, #tpu.memory_space<smem>>
    %84 = vector.broadcast %83 : f32 to vector<8x128xf32>
    %85 = arith.addf %82, %84 : vector<8x128xf32>
    %cst_20 = arith.constant 5.000000e-01 : f32
    %86 = vector.broadcast %cst_20 : f32 to vector<8x128xf32>
    %87 = arith.mulf %86, %85 : vector<8x128xf32>
    %cst_21 = arith.constant 0.707106769 : f32
    %88 = vector.broadcast %cst_21 : f32 to vector<8x128xf32>
    %89 = arith.mulf %85, %88 : vector<8x128xf32>
    %90 = math.erf %89 : vector<8x128xf32>
    %cst_22 = arith.constant 1.000000e+00 : f32
    %91 = vector.broadcast %cst_22 : f32 to vector<8x128xf32>
    %92 = arith.addf %91, %90 : vector<8x128xf32>
    %93 = arith.mulf %87, %92 : vector<8x128xf32>
    %c12 = arith.constant 12 : index
    %94 = memref.load %arg2[%c12] : memref<68xf32, #tpu.memory_space<smem>>
    %95 = vector.broadcast %94 : f32 to vector<8x128xf32>
    %96 = arith.mulf %1, %95 : vector<8x128xf32>
    %c13 = arith.constant 13 : index
    %97 = memref.load %arg2[%c13] : memref<68xf32, #tpu.memory_space<smem>>
    %98 = vector.broadcast %97 : f32 to vector<8x128xf32>
    %99 = arith.mulf %3, %98 : vector<8x128xf32>
    %100 = arith.addf %96, %99 : vector<8x128xf32>
    %c14 = arith.constant 14 : index
    %101 = memref.load %arg2[%c14] : memref<68xf32, #tpu.memory_space<smem>>
    %102 = vector.broadcast %101 : f32 to vector<8x128xf32>
    %103 = arith.mulf %5, %102 : vector<8x128xf32>
    %104 = arith.addf %100, %103 : vector<8x128xf32>
    %c28 = arith.constant 28 : index
    %105 = memref.load %arg2[%c28] : memref<68xf32, #tpu.memory_space<smem>>
    %106 = vector.broadcast %105 : f32 to vector<8x128xf32>
    %107 = arith.addf %104, %106 : vector<8x128xf32>
    %cst_23 = arith.constant 5.000000e-01 : f32
    %108 = vector.broadcast %cst_23 : f32 to vector<8x128xf32>
    %109 = arith.mulf %108, %107 : vector<8x128xf32>
    %cst_24 = arith.constant 0.707106769 : f32
    %110 = vector.broadcast %cst_24 : f32 to vector<8x128xf32>
    %111 = arith.mulf %107, %110 : vector<8x128xf32>
    %112 = math.erf %111 : vector<8x128xf32>
    %cst_25 = arith.constant 1.000000e+00 : f32
    %113 = vector.broadcast %cst_25 : f32 to vector<8x128xf32>
    %114 = arith.addf %113, %112 : vector<8x128xf32>
    %115 = arith.mulf %109, %114 : vector<8x128xf32>
    %c15 = arith.constant 15 : index
    %116 = memref.load %arg2[%c15] : memref<68xf32, #tpu.memory_space<smem>>
    %117 = vector.broadcast %116 : f32 to vector<8x128xf32>
    %118 = arith.mulf %1, %117 : vector<8x128xf32>
    %c16 = arith.constant 16 : index
    %119 = memref.load %arg2[%c16] : memref<68xf32, #tpu.memory_space<smem>>
    %120 = vector.broadcast %119 : f32 to vector<8x128xf32>
    %121 = arith.mulf %3, %120 : vector<8x128xf32>
    %122 = arith.addf %118, %121 : vector<8x128xf32>
    %c17 = arith.constant 17 : index
    %123 = memref.load %arg2[%c17] : memref<68xf32, #tpu.memory_space<smem>>
    %124 = vector.broadcast %123 : f32 to vector<8x128xf32>
    %125 = arith.mulf %5, %124 : vector<8x128xf32>
    %126 = arith.addf %122, %125 : vector<8x128xf32>
    %c29 = arith.constant 29 : index
    %127 = memref.load %arg2[%c29] : memref<68xf32, #tpu.memory_space<smem>>
    %128 = vector.broadcast %127 : f32 to vector<8x128xf32>
    %129 = arith.addf %126, %128 : vector<8x128xf32>
    %cst_26 = arith.constant 5.000000e-01 : f32
    %130 = vector.broadcast %cst_26 : f32 to vector<8x128xf32>
    %131 = arith.mulf %130, %129 : vector<8x128xf32>
    %cst_27 = arith.constant 0.707106769 : f32
    %132 = vector.broadcast %cst_27 : f32 to vector<8x128xf32>
    %133 = arith.mulf %129, %132 : vector<8x128xf32>
    %134 = math.erf %133 : vector<8x128xf32>
    %cst_28 = arith.constant 1.000000e+00 : f32
    %135 = vector.broadcast %cst_28 : f32 to vector<8x128xf32>
    %136 = arith.addf %135, %134 : vector<8x128xf32>
    %137 = arith.mulf %131, %136 : vector<8x128xf32>
    %c18 = arith.constant 18 : index
    %138 = memref.load %arg2[%c18] : memref<68xf32, #tpu.memory_space<smem>>
    %139 = vector.broadcast %138 : f32 to vector<8x128xf32>
    %140 = arith.mulf %1, %139 : vector<8x128xf32>
    %c19 = arith.constant 19 : index
    %141 = memref.load %arg2[%c19] : memref<68xf32, #tpu.memory_space<smem>>
    %142 = vector.broadcast %141 : f32 to vector<8x128xf32>
    %143 = arith.mulf %3, %142 : vector<8x128xf32>
    %144 = arith.addf %140, %143 : vector<8x128xf32>
    %c20 = arith.constant 20 : index
    %145 = memref.load %arg2[%c20] : memref<68xf32, #tpu.memory_space<smem>>
    %146 = vector.broadcast %145 : f32 to vector<8x128xf32>
    %147 = arith.mulf %5, %146 : vector<8x128xf32>
    %148 = arith.addf %144, %147 : vector<8x128xf32>
    %c30 = arith.constant 30 : index
    %149 = memref.load %arg2[%c30] : memref<68xf32, #tpu.memory_space<smem>>
    %150 = vector.broadcast %149 : f32 to vector<8x128xf32>
    %151 = arith.addf %148, %150 : vector<8x128xf32>
    %cst_29 = arith.constant 5.000000e-01 : f32
    %152 = vector.broadcast %cst_29 : f32 to vector<8x128xf32>
    %153 = arith.mulf %152, %151 : vector<8x128xf32>
    %cst_30 = arith.constant 0.707106769 : f32
    %154 = vector.broadcast %cst_30 : f32 to vector<8x128xf32>
    %155 = arith.mulf %151, %154 : vector<8x128xf32>
    %156 = math.erf %155 : vector<8x128xf32>
    %cst_31 = arith.constant 1.000000e+00 : f32
    %157 = vector.broadcast %cst_31 : f32 to vector<8x128xf32>
    %158 = arith.addf %157, %156 : vector<8x128xf32>
    %159 = arith.mulf %153, %158 : vector<8x128xf32>
    %c21 = arith.constant 21 : index
    %160 = memref.load %arg2[%c21] : memref<68xf32, #tpu.memory_space<smem>>
    %161 = vector.broadcast %160 : f32 to vector<8x128xf32>
    %162 = arith.mulf %1, %161 : vector<8x128xf32>
    %c22 = arith.constant 22 : index
    %163 = memref.load %arg2[%c22] : memref<68xf32, #tpu.memory_space<smem>>
    %164 = vector.broadcast %163 : f32 to vector<8x128xf32>
    %165 = arith.mulf %3, %164 : vector<8x128xf32>
    %166 = arith.addf %162, %165 : vector<8x128xf32>
    %c23 = arith.constant 23 : index
    %167 = memref.load %arg2[%c23] : memref<68xf32, #tpu.memory_space<smem>>
    %168 = vector.broadcast %167 : f32 to vector<8x128xf32>
    %169 = arith.mulf %5, %168 : vector<8x128xf32>
    %170 = arith.addf %166, %169 : vector<8x128xf32>
    %c31 = arith.constant 31 : index
    %171 = memref.load %arg2[%c31] : memref<68xf32, #tpu.memory_space<smem>>
    %172 = vector.broadcast %171 : f32 to vector<8x128xf32>
    %173 = arith.addf %170, %172 : vector<8x128xf32>
    %cst_32 = arith.constant 5.000000e-01 : f32
    %174 = vector.broadcast %cst_32 : f32 to vector<8x128xf32>
    %175 = arith.mulf %174, %173 : vector<8x128xf32>
    %cst_33 = arith.constant 0.707106769 : f32
    %176 = vector.broadcast %cst_33 : f32 to vector<8x128xf32>
    %177 = arith.mulf %173, %176 : vector<8x128xf32>
    %178 = math.erf %177 : vector<8x128xf32>
    %cst_34 = arith.constant 1.000000e+00 : f32
    %179 = vector.broadcast %cst_34 : f32 to vector<8x128xf32>
    %180 = arith.addf %179, %178 : vector<8x128xf32>
    %181 = arith.mulf %175, %180 : vector<8x128xf32>
    %c32 = arith.constant 32 : index
    %182 = memref.load %arg2[%c32] : memref<68xf32, #tpu.memory_space<smem>>
    %183 = vector.broadcast %182 : f32 to vector<8x128xf32>
    %184 = arith.mulf %27, %183 : vector<8x128xf32>
    %c33 = arith.constant 33 : index
    %185 = memref.load %arg2[%c33] : memref<68xf32, #tpu.memory_space<smem>>
    %186 = vector.broadcast %185 : f32 to vector<8x128xf32>
    %187 = arith.mulf %49, %186 : vector<8x128xf32>
    %188 = arith.addf %184, %187 : vector<8x128xf32>
    %c34 = arith.constant 34 : index
    %189 = memref.load %arg2[%c34] : memref<68xf32, #tpu.memory_space<smem>>
    %190 = vector.broadcast %189 : f32 to vector<8x128xf32>
    %191 = arith.mulf %71, %190 : vector<8x128xf32>
    %192 = arith.addf %188, %191 : vector<8x128xf32>
    %c35 = arith.constant 35 : index
    %193 = memref.load %arg2[%c35] : memref<68xf32, #tpu.memory_space<smem>>
    %194 = vector.broadcast %193 : f32 to vector<8x128xf32>
    %195 = arith.mulf %93, %194 : vector<8x128xf32>
    %196 = arith.addf %192, %195 : vector<8x128xf32>
    %c36 = arith.constant 36 : index
    %197 = memref.load %arg2[%c36] : memref<68xf32, #tpu.memory_space<smem>>
    %198 = vector.broadcast %197 : f32 to vector<8x128xf32>
    %199 = arith.mulf %115, %198 : vector<8x128xf32>
    %200 = arith.addf %196, %199 : vector<8x128xf32>
    %c37 = arith.constant 37 : index
    %201 = memref.load %arg2[%c37] : memref<68xf32, #tpu.memory_space<smem>>
    %202 = vector.broadcast %201 : f32 to vector<8x128xf32>
    %203 = arith.mulf %137, %202 : vector<8x128xf32>
    %204 = arith.addf %200, %203 : vector<8x128xf32>
    %c38 = arith.constant 38 : index
    %205 = memref.load %arg2[%c38] : memref<68xf32, #tpu.memory_space<smem>>
    %206 = vector.broadcast %205 : f32 to vector<8x128xf32>
    %207 = arith.mulf %159, %206 : vector<8x128xf32>
    %208 = arith.addf %204, %207 : vector<8x128xf32>
    %c39 = arith.constant 39 : index
    %209 = memref.load %arg2[%c39] : memref<68xf32, #tpu.memory_space<smem>>
    %210 = vector.broadcast %209 : f32 to vector<8x128xf32>
    %211 = arith.mulf %181, %210 : vector<8x128xf32>
    %212 = arith.addf %208, %211 : vector<8x128xf32>
    %c64 = arith.constant 64 : index
    %213 = memref.load %arg2[%c64] : memref<68xf32, #tpu.memory_space<smem>>
    %214 = vector.broadcast %213 : f32 to vector<8x128xf32>
    %215 = arith.addf %212, %214 : vector<8x128xf32>
    %cst_35 = arith.constant -1.000000e+00 : f32
    %216 = vector.broadcast %cst_35 : f32 to vector<8x128xf32>
    %217 = arith.maximumf %215, %216 : vector<8x128xf32>
    %cst_36 = arith.constant 2.000000e+00 : f32
    %218 = vector.broadcast %cst_36 : f32 to vector<8x128xf32>
    %219 = arith.minimumf %217, %218 : vector<8x128xf32>
    %c0_37 = arith.constant 0 : index
    %c0_38 = arith.constant 0 : index
    %c0_39 = arith.constant 0 : index
    %c0_40 = arith.constant 0 : index
    %220 = vector.load %arg4[%c0_37, %c0_38, %c0_39, %c0_40] : memref<1x4x8x128xf32, #tpu.memory_space<vmem>>, vector<1x1x8x128xf32>
    %221 = vector.shape_cast %220 : vector<1x1x8x128xf32> to vector<8x128xf32>
    %222 = vector.shape_cast %219 : vector<8x128xf32> to vector<1x1x8x128xf32>
    tpu.vector_store %arg4[%c0_37, %c0_38, %c0_39, %c0_40], %222 {strides = array<i32>} : memref<1x4x8x128xf32, #tpu.memory_space<vmem>>, vector<1x1x8x128xf32>,
    %c40 = arith.constant 40 : index
    %223 = memref.load %arg2[%c40] : memref<68xf32, #tpu.memory_space<smem>>
    %224 = vector.broadcast %223 : f32 to vector<8x128xf32>
    %225 = arith.mulf %27, %224 : vector<8x128xf32>
    %c41 = arith.constant 41 : index
    %226 = memref.load %arg2[%c41] : memref<68xf32, #tpu.memory_space<smem>>
    %227 = vector.broadcast %226 : f32 to vector<8x128xf32>
    %228 = arith.mulf %49, %227 : vector<8x128xf32>
    %229 = arith.addf %225, %228 : vector<8x128xf32>
    %c42 = arith.constant 42 : index
    %230 = memref.load %arg2[%c42] : memref<68xf32, #tpu.memory_space<smem>>
    %231 = vector.broadcast %230 : f32 to vector<8x128xf32>
    %232 = arith.mulf %71, %231 : vector<8x128xf32>
    %233 = arith.addf %229, %232 : vector<8x128xf32>
    %c43 = arith.constant 43 : index
    %234 = memref.load %arg2[%c43] : memref<68xf32, #tpu.memory_space<smem>>
    %235 = vector.broadcast %234 : f32 to vector<8x128xf32>
    %236 = arith.mulf %93, %235 : vector<8x128xf32>
    %237 = arith.addf %233, %236 : vector<8x128xf32>
    %c44 = arith.constant 44 : index
    %238 = memref.load %arg2[%c44] : memref<68xf32, #tpu.memory_space<smem>>
    %239 = vector.broadcast %238 : f32 to vector<8x128xf32>
    %240 = arith.mulf %115, %239 : vector<8x128xf32>
    %241 = arith.addf %237, %240 : vector<8x128xf32>
    %c45 = arith.constant 45 : index
    %242 = memref.load %arg2[%c45] : memref<68xf32, #tpu.memory_space<smem>>
    %243 = vector.broadcast %242 : f32 to vector<8x128xf32>
    %244 = arith.mulf %137, %243 : vector<8x128xf32>
    %245 = arith.addf %241, %244 : vector<8x128xf32>
    %c46 = arith.constant 46 : index
    %246 = memref.load %arg2[%c46] : memref<68xf32, #tpu.memory_space<smem>>
    %247 = vector.broadcast %246 : f32 to vector<8x128xf32>
    %248 = arith.mulf %159, %247 : vector<8x128xf32>
    %249 = arith.addf %245, %248 : vector<8x128xf32>
    %c47 = arith.constant 47 : index
    %250 = memref.load %arg2[%c47] : memref<68xf32, #tpu.memory_space<smem>>
    %251 = vector.broadcast %250 : f32 to vector<8x128xf32>
    %252 = arith.mulf %181, %251 : vector<8x128xf32>
    %253 = arith.addf %249, %252 : vector<8x128xf32>
    %c65 = arith.constant 65 : index
    %254 = memref.load %arg2[%c65] : memref<68xf32, #tpu.memory_space<smem>>
    %255 = vector.broadcast %254 : f32 to vector<8x128xf32>
    %256 = arith.addf %253, %255 : vector<8x128xf32>
    %cst_41 = arith.constant -1.000000e+00 : f32
    %257 = vector.broadcast %cst_41 : f32 to vector<8x128xf32>
    %258 = arith.maximumf %256, %257 : vector<8x128xf32>
    %cst_42 = arith.constant 2.000000e+00 : f32
    %259 = vector.broadcast %cst_42 : f32 to vector<8x128xf32>
    %260 = arith.minimumf %258, %259 : vector<8x128xf32>
    %c0_43 = arith.constant 0 : index
    %c1_44 = arith.constant 1 : index
    %c0_45 = arith.constant 0 : index
    %c0_46 = arith.constant 0 : index
    %261 = vector.load %arg4[%c0_43, %c1_44, %c0_45, %c0_46] : memref<1x4x8x128xf32, #tpu.memory_space<vmem>>, vector<1x1x8x128xf32>
    %262 = vector.shape_cast %261 : vector<1x1x8x128xf32> to vector<8x128xf32>
    %263 = vector.shape_cast %260 : vector<8x128xf32> to vector<1x1x8x128xf32>
    tpu.vector_store %arg4[%c0_43, %c1_44, %c0_45, %c0_46], %263 {strides = array<i32>} : memref<1x4x8x128xf32, #tpu.memory_space<vmem>>, vector<1x1x8x128xf32>,
    %c48 = arith.constant 48 : index
    %264 = memref.load %arg2[%c48] : memref<68xf32, #tpu.memory_space<smem>>
    %265 = vector.broadcast %264 : f32 to vector<8x128xf32>
    %266 = arith.mulf %27, %265 : vector<8x128xf32>
    %c49 = arith.constant 49 : index
    %267 = memref.load %arg2[%c49] : memref<68xf32, #tpu.memory_space<smem>>
    %268 = vector.broadcast %267 : f32 to vector<8x128xf32>
    %269 = arith.mulf %49, %268 : vector<8x128xf32>
    %270 = arith.addf %266, %269 : vector<8x128xf32>
    %c50 = arith.constant 50 : index
    %271 = memref.load %arg2[%c50] : memref<68xf32, #tpu.memory_space<smem>>
    %272 = vector.broadcast %271 : f32 to vector<8x128xf32>
    %273 = arith.mulf %71, %272 : vector<8x128xf32>
    %274 = arith.addf %270, %273 : vector<8x128xf32>
    %c51 = arith.constant 51 : index
    %275 = memref.load %arg2[%c51] : memref<68xf32, #tpu.memory_space<smem>>
    %276 = vector.broadcast %275 : f32 to vector<8x128xf32>
    %277 = arith.mulf %93, %276 : vector<8x128xf32>
    %278 = arith.addf %274, %277 : vector<8x128xf32>
    %c52 = arith.constant 52 : index
    %279 = memref.load %arg2[%c52] : memref<68xf32, #tpu.memory_space<smem>>
    %280 = vector.broadcast %279 : f32 to vector<8x128xf32>
    %281 = arith.mulf %115, %280 : vector<8x128xf32>
    %282 = arith.addf %278, %281 : vector<8x128xf32>
    %c53 = arith.constant 53 : index
    %283 = memref.load %arg2[%c53] : memref<68xf32, #tpu.memory_space<smem>>
    %284 = vector.broadcast %283 : f32 to vector<8x128xf32>
    %285 = arith.mulf %137, %284 : vector<8x128xf32>
    %286 = arith.addf %282, %285 : vector<8x128xf32>
    %c54 = arith.constant 54 : index
    %287 = memref.load %arg2[%c54] : memref<68xf32, #tpu.memory_space<smem>>
    %288 = vector.broadcast %287 : f32 to vector<8x128xf32>
    %289 = arith.mulf %159, %288 : vector<8x128xf32>
    %290 = arith.addf %286, %289 : vector<8x128xf32>
    %c55 = arith.constant 55 : index
    %291 = memref.load %arg2[%c55] : memref<68xf32, #tpu.memory_space<smem>>
    %292 = vector.broadcast %291 : f32 to vector<8x128xf32>
    %293 = arith.mulf %181, %292 : vector<8x128xf32>
    %294 = arith.addf %290, %293 : vector<8x128xf32>
    %c66 = arith.constant 66 : index
    %295 = memref.load %arg2[%c66] : memref<68xf32, #tpu.memory_space<smem>>
    %296 = vector.broadcast %295 : f32 to vector<8x128xf32>
    %297 = arith.addf %294, %296 : vector<8x128xf32>
    %cst_47 = arith.constant -1.000000e+00 : f32
    %298 = vector.broadcast %cst_47 : f32 to vector<8x128xf32>
    %299 = arith.maximumf %297, %298 : vector<8x128xf32>
    %cst_48 = arith.constant 2.000000e+00 : f32
    %300 = vector.broadcast %cst_48 : f32 to vector<8x128xf32>
    %301 = arith.minimumf %299, %300 : vector<8x128xf32>
    %c0_49 = arith.constant 0 : index
    %c2_50 = arith.constant 2 : index
    %c0_51 = arith.constant 0 : index
    %c0_52 = arith.constant 0 : index
    %302 = vector.load %arg4[%c0_49, %c2_50, %c0_51, %c0_52] : memref<1x4x8x128xf32, #tpu.memory_space<vmem>>, vector<1x1x8x128xf32>
    %303 = vector.shape_cast %302 : vector<1x1x8x128xf32> to vector<8x128xf32>
    %304 = vector.shape_cast %301 : vector<8x128xf32> to vector<1x1x8x128xf32>
    tpu.vector_store %arg4[%c0_49, %c2_50, %c0_51, %c0_52], %304 {strides = array<i32>} : memref<1x4x8x128xf32, #tpu.memory_space<vmem>>, vector<1x1x8x128xf32>,
    %c56 = arith.constant 56 : index
    %305 = memref.load %arg2[%c56] : memref<68xf32, #tpu.memory_space<smem>>
    %306 = vector.broadcast %305 : f32 to vector<8x128xf32>
    %307 = arith.mulf %27, %306 : vector<8x128xf32>
    %c57 = arith.constant 57 : index
    %308 = memref.load %arg2[%c57] : memref<68xf32, #tpu.memory_space<smem>>
    %309 = vector.broadcast %308 : f32 to vector<8x128xf32>
    %310 = arith.mulf %49, %309 : vector<8x128xf32>
    %311 = arith.addf %307, %310 : vector<8x128xf32>
    %c58 = arith.constant 58 : index
    %312 = memref.load %arg2[%c58] : memref<68xf32, #tpu.memory_space<smem>>
    %313 = vector.broadcast %312 : f32 to vector<8x128xf32>
    %314 = arith.mulf %71, %313 : vector<8x128xf32>
    %315 = arith.addf %311, %314 : vector<8x128xf32>
    %c59 = arith.constant 59 : index
    %316 = memref.load %arg2[%c59] : memref<68xf32, #tpu.memory_space<smem>>
    %317 = vector.broadcast %316 : f32 to vector<8x128xf32>
    %318 = arith.mulf %93, %317 : vector<8x128xf32>
    %319 = arith.addf %315, %318 : vector<8x128xf32>
    %c60 = arith.constant 60 : index
    %320 = memref.load %arg2[%c60] : memref<68xf32, #tpu.memory_space<smem>>
    %321 = vector.broadcast %320 : f32 to vector<8x128xf32>
    %322 = arith.mulf %115, %321 : vector<8x128xf32>
    %323 = arith.addf %319, %322 : vector<8x128xf32>
    %c61 = arith.constant 61 : index
    %324 = memref.load %arg2[%c61] : memref<68xf32, #tpu.memory_space<smem>>
    %325 = vector.broadcast %324 : f32 to vector<8x128xf32>
    %326 = arith.mulf %137, %325 : vector<8x128xf32>
    %327 = arith.addf %323, %326 : vector<8x128xf32>
    %c62 = arith.constant 62 : index
    %328 = memref.load %arg2[%c62] : memref<68xf32, #tpu.memory_space<smem>>
    %329 = vector.broadcast %328 : f32 to vector<8x128xf32>
    %330 = arith.mulf %159, %329 : vector<8x128xf32>
    %331 = arith.addf %327, %330 : vector<8x128xf32>
    %c63 = arith.constant 63 : index
    %332 = memref.load %arg2[%c63] : memref<68xf32, #tpu.memory_space<smem>>
    %333 = vector.broadcast %332 : f32 to vector<8x128xf32>
    %334 = arith.mulf %181, %333 : vector<8x128xf32>
    %335 = arith.addf %331, %334 : vector<8x128xf32>
    %c67 = arith.constant 67 : index
    %336 = memref.load %arg2[%c67] : memref<68xf32, #tpu.memory_space<smem>>
    %337 = vector.broadcast %336 : f32 to vector<8x128xf32>
    %338 = arith.addf %335, %337 : vector<8x128xf32>
    %cst_53 = arith.constant -1.000000e+00 : f32
    %339 = vector.broadcast %cst_53 : f32 to vector<8x128xf32>
    %340 = arith.maximumf %338, %339 : vector<8x128xf32>
    %cst_54 = arith.constant 2.000000e+00 : f32
    %341 = vector.broadcast %cst_54 : f32 to vector<8x128xf32>
    %342 = arith.minimumf %340, %341 : vector<8x128xf32>
    %c0_55 = arith.constant 0 : index
    %c3_56 = arith.constant 3 : index
    %c0_57 = arith.constant 0 : index
    %c0_58 = arith.constant 0 : index
    %343 = vector.load %arg4[%c0_55, %c3_56, %c0_57, %c0_58] : memref<1x4x8x128xf32, #tpu.memory_space<vmem>>, vector<1x1x8x128xf32>
    %344 = vector.shape_cast %343 : vector<1x1x8x128xf32> to vector<8x128xf32>
    %345 = vector.shape_cast %342 : vector<8x128xf32> to vector<1x1x8x128xf32>
    tpu.vector_store %arg4[%c0_55, %c3_56, %c0_57, %c0_58], %345 {strides = array<i32>} : memref<1x4x8x128xf32, #tpu.memory_space<vmem>>, vector<1x1x8x128xf32>,
    return
  }
  func.func @transform_0(%arg0: i32, %arg1: i32) -> i32 {
    %c0_i32 = arith.constant 0 : i32
    %c0_i32_0 = arith.constant 0 : i32
    return %c0_i32 : i32
  }
  func.func @transform_1(%arg0: i32, %arg1: i32) -> (i32, i32, i32, i32) {
    %c0_i32 = arith.constant 0 : i32
    %c0_i32_0 = arith.constant 0 : i32
    %c0_i32_1 = arith.constant 0 : i32
    return %arg0, %c0_i32, %arg1, %c0_i32_0 : i32, i32, i32, i32
  }
  func.func @transform_2(%arg0: i32, %arg1: i32) -> (i32, i32, i32, i32) {
    %c0_i32 = arith.constant 0 : i32
    %c0_i32_0 = arith.constant 0 : i32
    %c0_i32_1 = arith.constant 0 : i32
    return %arg0, %c0_i32, %arg1, %c0_i32_0 : i32, i32, i32, i32
  }
}

</mosaic_0001>

<bundles_post_ra>
// kernel: tpu_custom_call.1
= control target key start
LH: loop header
LB: loop body
LE: loop exit
PB: predicated region body
PF: predicated region fallthrough
CT: control target
= control target key end

     0   :  { %7 = vsyncpa [#allocation5], 0  ;;  %s1324_s0 = inlined_call_operand.hbm [shape: f32[68], index: 0, kind: input, shape index: {}]   ;;  %s1325_s1 = inlined_call_operand.hbm [shape: f32[2,3,8,128], index: 1, kind: input, shape index: {}]   ;;  %s1326_s2 = inlined_call_operand.hbm [shape: f32[2,4,8,128], index: 2, kind: output, shape index: {}]  }
   0x1   :  { %8 = vsyncpa [#allocation3], 0 }
   0x2   :  { %10 = vsyncpa [#allocation3 + $0x1], 0 }
   0x3   :  { %11 = vsyncpa [#allocation4], 0 }
   0x4   :  { %13 = vsyncpa [#allocation4 + $0x1], 0  ;;  %s941_s9 = smov 0   ;;  %s943_s10 = smov 0  }
   0x5   :  { %s945_s11 = smov 0   ;;  %s947_s12 = smov 0  }
   0x6   :  { %s949_s13 = smov 0   ;;  %s951_s14 = smov 0  }
   0x7 LB: > { %s611_s15 = sadd.s32 4294967295, %s917_s14   ;;  %s612_s16 = sadd.s32 4294967294, %s917_s14   ;;  %s917_s14 = sphi %s951_s14, %s19_s14   ;;  %s913_s13 = sphi %s949_s13, %s1339_s13   ;;  %s909_s12 = sphi %s947_s12, %s1338_s12   ;;  %s905_s11 = sphi %s945_s11, %s1337_s11   ;;  %s901_s10 = sphi %s943_s10, %s1336_s10   ;;  %s897_s9 = sphi %s941_s9, %s1335_s9  }
   0x8   : > { %s61_s17 = sadd.s32 1, %s905_s11  ;;  %p68_p0 = scmp.ne.s32.totalorder %s905_s11, %s901_s10 }
   0x9   : > { %p69_p1 = scmp.eq.s32.totalorder %s917_s14, 0  ;;  %p74_p2 = scmp.ne.s32.totalorder %s901_s10, %s897_s9 }
   0xa   : > { %p979_p3 = scmp.eq.s32.totalorder %s611_s15, 0  ;;  %p100_p4 = scmp.eq.s32.totalorder %s611_s15, 1 }
   0xb   : > { %p70_p5 = por %p69_p1, %p68_p0  ;;  %p106_p6 = scmp.eq.s32.totalorder %s612_s16, 1 }
   0xc   : > { %p985_p7 = por %p979_p3, %p74_p2  ;;  %p989_p8 = por %p100_p4, %p68_p0 }
   0xd   : > { %p993_p9 = por %p106_p6, %p74_p2  ;;  %p613_p10 = scmp.ge.s32.totalorder %s917_s14, 1 }
   0xe   : > { %p113_p11 = scmp.lt.s32.totalorder %s917_s14, 3  ;;  %p722_p1 = scmp.lt.s32.totalorder %s917_s14, 2 }
   0xf   : > { %s1330_s21 = scalar_select %p993_p9, 1, 0 }
  0x10   : > { %p1000_p13 = pnand %p613_p10, %p113_p11  ;;  %s135_s23 = sand.u32 1, %s905_s11  }
  0x11   : > { %p1008_p2 = pnand %p722_p1, %p70_p5  ;;  %s31_s25 = sadd.s32 1, %s913_s13 }
  0x12   : > { %p709_p0 = pneg %p1000_p13  ;;  %s698_s26 = smul.u32 24, %s135_s23 }
  0x13   : > { %p33_p6 = scmp.ge.s32.totalorder %s31_s25, 2  ;;  %s919_s27 = smov [#allocation2]  }
  0x14   : > { %p710_p4 = pnand %p709_p0, %p979_p3  ;;  %s699_s30 = smul.u32 384, %s913_s13 }
  0x15   : > { %s1341_s25 = smov (%p33_p6, %s31_s25), 0  ;;  %s139_s4 = scalar_lea.vmem [#allocation6], %s698_s26 }
  0x16   : > { %712 = dma.hbm_to_smem (!%p710_p4), %s1324_s0, 16, %s919_s27, [#allocation5]  }
  0x17   : > { %s56_s3 = ssub.s32 %s913_s13, %s1341_s25  ;;  %s147_s5 = sshll.u32 %s139_s4, 4  ;;  %s148_s5 = int_to_ptr.vmem [resolvable:$true] %s147_s5 }
  0x18   : > { %p59_p5 = scmp.eq.s32.totalorder %s56_s3, 0  ;;  %s146_s8 = scalar_lea.hbm %s1325_s1, %s699_s30 }
  0x19   : > { %s136_s16 = scalar_lea.sflag [#allocation3], %s135_s23  ;;  %p807_p10 = pneg %p1008_p2 }
  0x1a   : > { %s1029_s15 = scalar_select %p59_p5, %s905_s11, %s61_s17  }
  0x1b   : > { %s818_s27 = scalar_lea.vmem %s148_s5, 384  ;;  %s920_s28 = smov [#allocation6]  }
  0x1c   : > { %p819_p11 = scmp.ne.s32.totalorder %s148_s5, %s818_s27  ;;  %s823_s29 = sshll.u32 %s920_s28, 4  ;;  %s824_s29 = int_to_ptr.vmem [resolvable:$false] %s823_s29 }
  0x1d   : > { %s825_s26 = scalar_lea.vmem %s824_s29, 768  ;;  %p826_p4 = scmp.lt.s32.totalorder %s148_s5, %s824_s29 }
  0x1e   : > { %p821_p1 = pnand %p819_p11, %p807_p10  ;;  %p827_p6 = scmp.lt.s32.totalorder %s825_s26, %s818_s27 }
  0x20   : > { %p822_p0 = pneg %p821_p1  ;;  %p828_p12 = por %p827_p6, %p826_p4 }
  0x22   : > { %p829_p9 = pnand %p828_p12, %p822_p0 }
  0x24   : > { %832 = shalt.err (!%p829_p9)
}
  0x25   : > { %s921_s30 = smov 128   ;;  %s922_s17 = smov 8  }
  0x26   : > { %716 = dma.hbm_to_vmem [thread:$0]  (!%p1008_p2), %s146_s8, 384, %s148_s5, %s136_s16, %s921_s30, %s921_s30, %s922_s17  }
  0x27   : > { %159 = sbr.rel (%p1000_p13) target bundleno = 155 (0x9b), region = 28 }
  0x2c   : > { %884 = dma.done.wait (%p979_p3), [#allocation5], 16  }
  0x2d   : > { %886 = vsyncadd (%p979_p3), [#allocation5], 4294967280  ;;  %s1042_s23 = sand.u32 1, %s901_s10  }
  0x2e   : > { %s700_s3 = smul.u32 24, %s1042_s23  ;;  %s166_s4 = scalar_lea.sflag [#allocation3], %s1042_s23 }
  0x30   : > { %s169_s6 = scalar_lea.vmem [#allocation6], %s700_s3 }
  0x31   : > { %888 = dma.done.wait (%p985_p7), %s166_s4, 384  }
  0x32   : > { %890 = vsyncadd (%p985_p7), %s166_s4, 4294966912 }
  0x33   : > { %174 = sfence }
  0x34   : > { %s196_s22 = sld [smem:[#allocation2]]  ;;  %v1050_v0 = vld [vmem:[%s169_s6] sm:$0xff]  ;;  %v1052_v1 = vld [vmem:[%s169_s6 + $0x8] sm:$0xff]  ;;  %v1054_v2 = vld [vmem:[%s169_s6 + $0x10] sm:$0xff] }
  0x35   : > { %s622_s24 = sld [smem:[#allocation2 + $0x1]] }
  0x36   : > { %s623_s5 = sld [smem:[#allocation2 + $0x2]] }
  0x37   : > { %s624_s18 = sld [smem:[#allocation2 + $0x18]] }
  0x38   : > { %s625_s7 = sld [smem:[#allocation2 + $0x3]] }
  0x39   : > { %s626_s8 = sld [smem:[#allocation2 + $0x4]] }
  0x3a   : > { %v197_v3 = vstv %s196_s22  ;;  %s627_s16 = sld [smem:[#allocation2 + $0x5]] }
  0x3b   : > { %v198_v4 = vmul.f32 %v197_v3, %v1050_v0  ;;  %v200_v5 = vstv %s622_s24  ;;  %s1057_s19 = sld [smem:[#allocation2 + $0x19]] }
  0x3c   : > { %v201_v6 = vmul.f32 %v1052_v1, %v200_v5  ;;  %v204_v7 = vstv %s623_s5  ;;  %s629_s27 = sld [smem:[#allocation2 + $0x6]] }
  0x3d   : > { %v205_v8 = vmul.f32 %v1054_v2, %v204_v7  ;;  %s630_s28 = sld [smem:[#allocation2 + $0x7]]  ;;  %v208_v11 = vstv %s624_s18 }
  0x3e   : > { %v202_v9 = vadd.f32 %v201_v6, %v198_v4  ;;  %v216_v10 = vstv %s625_s7  ;;  %s631_s29 = sld [smem:[#allocation2 + $0x8]] }
  0x3f   : > { %v217_v12 = vmul.f32 %v216_v10, %v1050_v0  ;;  %v219_v13 = vstv %s626_s8  ;;  %s1062_s26 = sld [smem:[#allocation2 + $0x1a]] }
  0x40   : > { %v206_v14 = vadd.f32 %v205_v8, %v202_v9  ;;  %v220_v15 = vmul.f32 %v1052_v1, %v219_v13  ;;  %v223_v16 = vstv %s627_s16  ;;  %s633_s30 = sld [smem:[#allocation2 + $0x9]] }
  0x41   : > { %v224_v17 = vmul.f32 %v1054_v2, %v223_v16  ;;  %s634_s17 = sld [smem:[#allocation2 + $0xa]]  ;;  %v227_v21 = vstv %s1057_s19 }
  0x42   : > { %v209_v18 = vadd.f32 %v208_v11, %v206_v14  ;;  %v221_v19 = vadd.f32 %v220_v15, %v217_v12  ;;  %v235_v20 = vstv %s629_s27  ;;  %s635_s3 = sld [smem:[#allocation2 + $0xb]] }
  0x43   : > { %v236_v22 = vmul.f32 %v235_v20, %v1050_v0  ;;  %v238_v23 = vstv %s630_s28  ;;  %s1068_s4 = sld [smem:[#allocation2 + $0x1b]] }
  0x44   : > { %v211_v24 = vmul.f32 0.70710677, %v209_v18  ;;  %v225_v25 = vadd.f32 %v224_v17, %v221_v19  ;;  %v239_v26 = vmul.f32 %v1052_v1, %v238_v23  ;;  %s637_s6 = sld [smem:[#allocation2 + $0xc]]  ;;  %v242_v27 = vstv %s631_s29 }
  0x45   : > { %s638_s22 = sld [smem:[#allocation2 + $0xd]]  ;;  %v243_v30 = vmul.f32 %v1054_v2, %v242_v27  ;;  %v246_v31 = vstv %s1062_s26  ;;  %v210_v62 = vmul.f32 0.5, %v209_v18 }
  0x46   : > { %778 = verf.f32 %v211_v24  ;;  %v1071_v28 = vadd.f32 %v227_v21, %v225_v25  ;;  %v240_v29 = vadd.f32 %v239_v26, %v236_v22  ;;  %s639_s24 = sld [smem:[#allocation2 + $0xe]]  ;;  %v254_v32 = vstv %s633_s30 }
  0x47   : > { %v257_v33 = vstv %s634_s17  ;;  %s1075_s5 = sld [smem:[#allocation2 + $0x1c]]  ;;  %v255_v36 = vmul.f32 %v254_v32, %v1050_v0 }
  0x48   : > { %v230_v34 = vmul.f32 0.70710677, %v1071_v28  ;;  %v244_v35 = vadd.f32 %v243_v30, %v240_v29  ;;  %s641_s18 = sld [smem:[#allocation2 + $0xf]]  ;;  %v258_v37 = vmul.f32 %v1052_v1, %v257_v33  ;;  %v261_v38 = vstv %s635_s3 }
  0x49   : > { %s642_s7 = sld [smem:[#allocation2 + $0x10]]  ;;  %v262_v40 = vmul.f32 %v1054_v2, %v261_v38  ;;  %v265_v46 = vstv %s1068_s4  ;;  %v229_v14 = vmul.f32 0.5, %v1071_v28 }
  0x4a   : > { %780 = verf.f32 %v230_v34  ;;  %v1080_v39 = vadd.f32 %v246_v31, %v244_v35  ;;  %v273_v41 = vstv %s637_s6  ;;  %s643_s8 = sld [smem:[#allocation2 + $0x11]]  ;;  %v259_v42 = vadd.f32 %v258_v37, %v255_v36 }
  0x4b   : > { %v274_v43 = vmul.f32 %v273_v41, %v1050_v0  ;;  %v276_v44 = vstv %s638_s22  ;;  %s1084_s16 = sld [smem:[#allocation2 + $0x1d]] }
  0x4c   : > { %v249_v45 = vmul.f32 0.70710677, %v1080_v39  ;;  %v277_v47 = vmul.f32 %v1052_v1, %v276_v44  ;;  %v280_v48 = vstv %s639_s24  ;;  %s645_s19 = sld [smem:[#allocation2 + $0x12]]  ;;  %v263_v49 = vadd.f32 %v262_v40, %v259_v42 }
  0x4d   : > { %v281_v50 = vmul.f32 %v1054_v2, %v280_v48  ;;  %s1090_s27 = sld [smem:[#allocation2 + $0x13]]  ;;  %v284_v54 = vstv %s1075_s5  ;;  %v248_v26 = vmul.f32 0.5, %v1080_v39 }
  0x4e   : > { %782 = verf.f32 %v249_v45  ;;  %v278_v51 = vadd.f32 %v277_v47, %v274_v43  ;;  %v292_v52 = vstv %s641_s18  ;;  %s1092_s28 = sld [smem:[#allocation2 + $0x14]]  ;;  %v1094_v53 = vadd.f32 %v265_v46, %v263_v49 }
  0x4f   : > { %v293_v55 = vmul.f32 %v292_v52, %v1050_v0  ;;  %v295_v56 = vstv %s642_s7  ;;  %s1098_s29 = sld [smem:[#allocation2 + $0x1e]] }
  0x50   : > { %v282_v57 = vadd.f32 %v281_v50, %v278_v51  ;;  %v296_v58 = vmul.f32 %v1052_v1, %v295_v56  ;;  %v299_v59 = vstv %s643_s8  ;;  %s1101_s26 = sld [smem:[#allocation2 + $0x15]]  ;;  %v268_v60 = vmul.f32 0.70710677, %v1094_v53 }
  0x51   : > { %v300_v61 = vmul.f32 %v1054_v2, %v299_v59  ;;  %s1105_s30 = sld [smem:[#allocation2 + $0x16]]  ;;  %v303_v6 = vstv %s1084_s16  ;;  %v267_v42 = vmul.f32 0.5, %v1094_v53 }
  0x52   : > { %v1107_v63 = vadd.f32 %v284_v54, %v282_v57  ;;  %v297_v3 = vadd.f32 %v296_v58, %v293_v55  ;;  %v311_v4 = vstv %s645_s19  ;;  %s1109_s17 = sld [smem:[#allocation2 + $0x17]]  ;;  %784 = verf.f32 %v268_v60 }
  0x53   : > { %v779_v5 = vpop.eup %778  ;;  %v312_v7 = vmul.f32 %v311_v4, %v1050_v0  ;;  %v314_v8 = vstv %s1090_s27  ;;  %s1114_s3 = sld [smem:[#allocation2 + $0x1f]] }
  0x54   : > { %v213_v9 = vadd.f32 1.0, %v779_v5  ;;  %v287_v10 = vmul.f32 0.70710677, %v1107_v63  ;;  %v301_v11 = vadd.f32 %v300_v61, %v297_v3  ;;  %s1117_s4 = sld [smem:[#allocation2 + $0x20]]  ;;  %v315_v12 = vmul.f32 %v1052_v1, %v314_v8 }
  0x55   : > { %v318_v13 = vstv %s1092_s28  ;;  %s1121_s6 = sld [smem:[#allocation2 + $0x21]]  ;;  %v322_v24 = vstv %s1098_s29  ;;  %v286_v49 = vmul.f32 0.5, %v1107_v63 }
  0x56   : > { %786 = verf.f32 %v287_v10  ;;  %v1124_v15 = vadd.f32 %v303_v6, %v301_v11  ;;  %v319_v16 = vmul.f32 %v1054_v2, %v318_v13  ;;  %s1127_s22 = sld [smem:[#allocation2 + $0x22]]  ;;  %v1129_v18 = vmul.f32 %v213_v9, %v210_v62 }
  0x57   : > { %v781_v17 = vpop.eup %780  ;;  %v316_v19 = vadd.f32 %v315_v12, %v312_v7  ;;  %v330_v20 = vstv %s1101_s26  ;;  %v333_v21 = vstv %s1105_s30  ;;  %s1133_s24 = sld [smem:[#allocation2 + $0x23]] }
  0x58   : > { %v232_v22 = vadd.f32 1.0, %v781_v17  ;;  %v306_v23 = vmul.f32 0.70710677, %v1124_v15  ;;  %v331_v25 = vmul.f32 %v330_v20, %v1050_v0  ;;  %s1138_s5 = sld [smem:[#allocation2 + $0x24]]  ;;  %v334_v28 = vmul.f32 %v1052_v1, %v333_v21 }
  0x59   : > { %v320_v27 = vadd.f32 %v319_v16, %v316_v19  ;;  %v337_v29 = vstv %s1109_s17  ;;  %s1143_s18 = sld [smem:[#allocation2 + $0x25]]  ;;  %v341_v37 = vstv %s1114_s3  ;;  %v305_v63 = vmul.f32 0.5, %v1124_v15 }
  0x5a   : > { %v1145_v30 = vmul.f32 %v232_v22, %v229_v14  ;;  %788 = verf.f32 %v306_v23  ;;  %v338_v31 = vmul.f32 %v1054_v2, %v337_v29  ;;  %v349_v32 = vstv %s1117_s4  ;;  %s1149_s7 = sld [smem:[#allocation2 + $0x26]] }
  0x5b   : > { %v783_v0 = vpop.eup %782  ;;  %v1151_v33 = vadd.f32 %v322_v24, %v320_v27  ;;  %v335_v34 = vadd.f32 %v334_v28, %v331_v25  ;;  %v350_v35 = vmul.f32 %v349_v32, %v1129_v18  ;;  %v352_v36 = vstv %s1121_s6  ;;  %s1155_s8 = sld [smem:[#allocation2 + $0x27]] }
  0x5c   : > { %v251_v1 = vadd.f32 1.0, %v783_v0  ;;  %v353_v38 = vmul.f32 %v352_v36, %v1145_v30  ;;  %s1159_s16 = sld [smem:[#allocation2 + $0x40]]  ;;  %v356_v40 = vstv %s1127_s22 }
  0x5d   : > { %v325_v2 = vmul.f32 0.70710677, %v1151_v33  ;;  %v339_v39 = vadd.f32 %v338_v31, %v335_v34  ;;  %s662_s19 = sld [smem:[#allocation2 + $0x28]]  ;;  %v360_v50 = vstv %s1133_s24  ;;  %v324_v19 = vmul.f32 0.5, %v1151_v33 }
  0x5e   : > { %v1163_v41 = vmul.f32 %v251_v1, %v248_v26  ;;  %s663_s27 = sld [smem:[#allocation2 + $0x29]]  ;;  %v354_v44 = vadd.f32 %v353_v38, %v350_v35  ;;  %v364_v59 = vstv %s1138_s5 }
  0x5f   : > { %790 = verf.f32 %v325_v2  ;;  %v342_v43 = vadd.f32 %v341_v37, %v339_v39  ;;  %s664_s28 = sld [smem:[#allocation2 + $0x2a]]  ;;  %v785_v45 = vpop.eup %784  ;;  %v368_v12 = vstv %s1143_s18 }
  0x60   : > { %v357_v46 = vmul.f32 %v356_v40, %v1163_v41  ;;  %s665_s29 = sld [smem:[#allocation2 + $0x2b]]  ;;  %v270_v47 = vadd.f32 1.0, %v785_v45  ;;  %v372_v20 = vstv %s1149_s7 }
  0x61   : > { %v344_v48 = vmul.f32 0.70710677, %v342_v43  ;;  %s1167_s26 = sld [smem:[#allocation2 + $0x2c]]  ;;  %v343_v23 = vmul.f32 0.5, %v342_v43 }
  0x62   : > { %s1171_s30 = sld [smem:[#allocation2 + $0x2d]]  ;;  %v1173_v52 = vmul.f32 %v270_v47, %v267_v42  ;;  %v358_v53 = vadd.f32 %v357_v46, %v354_v44  ;;  %v376_v44 = vstv %s1155_s8 }
  0x63   : > { %v787_v51 = vpop.eup %786  ;;  %792 = verf.f32 %v344_v48  ;;  %v386_v54 = vstv %s662_s19  ;;  %s1175_s17 = sld [smem:[#allocation2 + $0x2e]] }
  0x64   : > { %v289_v55 = vadd.f32 1.0, %v787_v51  ;;  %v387_v56 = vmul.f32 %v386_v54, %v1129_v18  ;;  %v389_v57 = vstv %s663_s27  ;;  %s1178_s3 = sld [smem:[#allocation2 + $0x2f]]  ;;  %v361_v58 = vmul.f32 %v360_v50, %v1173_v52 }
  0x65   : > { %v390_v60 = vmul.f32 %v389_v57, %v1145_v30  ;;  %v393_v61 = vstv %s664_s28  ;;  %s1183_s4 = sld [smem:[#allocation2 + $0x41]] }
  0x66   : > { %v1185_v62 = vmul.f32 %v289_v55, %v286_v49  ;;  %v394_v3 = vmul.f32 %v393_v61, %v1163_v41  ;;  %v397_v4 = vstv %s665_s29  ;;  %s672_s6 = sld [smem:[#allocation2 + $0x30]]  ;;  %v362_v6 = vadd.f32 %v361_v58, %v358_v53 }
  0x67   : > { %v789_v5 = vpop.eup %788  ;;  %v391_v7 = vadd.f32 %v390_v60, %v387_v56  ;;  %v398_v8 = vmul.f32 %v397_v4, %v1173_v52  ;;  %v401_v9 = vstv %s1167_s26  ;;  %s673_s22 = sld [smem:[#allocation2 + $0x31]]  ;;  %v380_v55 = vstv %s1159_s16 }
  0x68   : > { %v308_v10 = vadd.f32 1.0, %v789_v5  ;;  %v365_v11 = vmul.f32 %v364_v59, %v1185_v62  ;;  %s1192_s24 = sld [smem:[#allocation2 + $0x32]]  ;;  %v402_v14 = vmul.f32 %v401_v9, %v1185_v62  ;;  %v405_v15 = vstv %s1171_s30 }
  0x69   : > { %v395_v13 = vadd.f32 %v394_v3, %v391_v7  ;;  %s1197_s5 = sld [smem:[#allocation2 + $0x33]]  ;;  %v409_v0 = vstv %s1175_s17 }
  0x6a   : > { %v1199_v16 = vmul.f32 %v308_v10, %v305_v63  ;;  %v366_v17 = vadd.f32 %v365_v11, %v362_v6  ;;  %s1201_s19 = sld [smem:[#allocation2 + $0x34]]  ;;  %v413_v46 = vstv %s1178_s3 }
  0x6b   : > { %v399_v21 = vadd.f32 %v398_v8, %v395_v13  ;;  %s1205_s27 = sld [smem:[#allocation2 + $0x35]]  ;;  %v417_v56 = vstv %s1183_s4  ;;  %s619_s4 = sshll.u32 %s1042_s23, 5 }
  0x6c   : > { %v791_v22 = vpop.eup %790  ;;  %v369_v24 = vmul.f32 %v368_v12, %v1199_v16  ;;  %v406_v25 = vmul.f32 %v405_v15, %v1199_v16  ;;  %v424_v26 = vstv %s672_s6  ;;  %s1209_s18 = sld [smem:[#allocation2 + $0x36]] }
  0x6d   : > { %v327_v27 = vadd.f32 1.0, %v791_v22  ;;  %v403_v28 = vadd.f32 %v402_v14, %v399_v21  ;;  %v425_v29 = vmul.f32 %v424_v26, %v1129_v18  ;;  %v427_v31 = vstv %s673_s22  ;;  %s1212_s7 = sld [smem:[#allocation2 + $0x37]] }
  0x6e   : > { %v370_v32 = vadd.f32 %v369_v24, %v366_v17  ;;  %v428_v33 = vmul.f32 %v427_v31, %v1145_v30  ;;  %v431_v34 = vstv %s1192_s24  ;;  %s1217_s28 = sld [smem:[#allocation2 + $0x42]]  ;;  %s190_s24 = scalar_lea.vmem [#allocation7], %s619_s4 }
  0x6f   : > { %v1219_v35 = vmul.f32 %v327_v27, %v324_v19  ;;  %v407_v36 = vadd.f32 %v406_v25, %v403_v28  ;;  %v432_v1 = vmul.f32 %v431_v34, %v1163_v41  ;;  %v435_v37 = vstv %s1197_s5  ;;  %s1223_s29 = sld [smem:[#allocation2 + $0x38]]  ;;  %s514_s5 = sshll.u32 %s190_s24, 4  ;;  %s1271_s5 = int_to_ptr.vmem [resolvable:$true] %s514_s5 }
  0x70   : > { %v793_v38 = vpop.eup %792  ;;  %v429_v2 = vadd.f32 %v428_v33, %v425_v29  ;;  %v436_v39 = vmul.f32 %v435_v37, %v1173_v52  ;;  %v439_v40 = vstv %s1201_s19  ;;  %s1227_s26 = sld [smem:[#allocation2 + $0x39]]  ;;  %s697_s19 = sshll.u32 %s909_s12, 9 }
  0x71   : > { %v346_v42 = vadd.f32 1.0, %v793_v38  ;;  %v373_v43 = vmul.f32 %v372_v20, %v1219_v35  ;;  %v410_v45 = vmul.f32 %v409_v0, %v1219_v35  ;;  %s1232_s30 = sld [smem:[#allocation2 + $0x3a]]  ;;  %v440_v48 = vmul.f32 %v439_v40, %v1185_v62  ;;  %s923_s12 = smov [#allocation7]  }
  0x72   : > { %v433_v47 = vadd.f32 %v432_v1, %v429_v2  ;;  %v443_v49 = vstv %s1205_s27  ;;  %s1237_s17 = sld [smem:[#allocation2 + $0x3b]]  ;;  %v447_v54 = vstv %s1209_s18 }
  0x73   : > { %v347_v50 = vmul.f32 %v346_v42, %v343_v23  ;;  %v374_v51 = vadd.f32 %v373_v43, %v370_v32  ;;  %v411_v53 = vadd.f32 %v410_v45, %v407_v36  ;;  %s1240_s6 = sld [smem:[#allocation2 + $0x3c]]  ;;  %v444_v58 = vmul.f32 %v443_v49, %v1199_v16 }
  0x74   : > { %v437_v57 = vadd.f32 %v436_v39, %v433_v47  ;;  %s1245_s8 = sld [smem:[#allocation2 + $0x3d]]  ;;  %v451_v61 = vstv %s1212_s7  ;;  %v448_v4 = vmul.f32 %v447_v54, %v1219_v35  ;;  %v455_v21 = vstv %s1217_s28  ;;  %s1276_s7 = scalar_lea.hbm %s1326_s2, %s697_s19 }
  0x75   : > { %v377_v59 = vmul.f32 %v376_v44, %v347_v50  ;;  %v414_v60 = vmul.f32 %v413_v46, %v347_v50  ;;  %v462_v63 = vstv %s1223_s29  ;;  %s1249_s3 = sld [smem:[#allocation2 + $0x3e]]  ;;  %v452_v12 = vmul.f32 %v451_v61, %v347_v50  ;;  %s500_s28 = scalar_lea.sflag [#allocation4], %s1042_s23 }
  0x76   : > { %v441_v3 = vadd.f32 %v440_v48, %v437_v57  ;;  %v463_v5 = vmul.f32 %v462_v63, %v1129_v18  ;;  %v465_v6 = vstv %s1227_s26  ;;  %s1254_s16 = sld [smem:[#allocation2 + $0x3f]]  ;;  %s833_s29 = scalar_lea.vmem %s1271_s5, 512 }
  0x77   : > { %v378_v7 = vadd.f32 %v377_v59, %v374_v51  ;;  %v415_v8 = vadd.f32 %v414_v60, %v411_v53  ;;  %v466_v9 = vmul.f32 %v465_v6, %v1145_v30  ;;  %v469_v10 = vstv %s1232_s30  ;;  %s690_s22 = sld [smem:[#allocation2 + $0x43]]  ;;  %p834_p3 = scmp.ne.s32.totalorder %s1271_s5, %s833_s29 }
  0x78   : > { %v445_v11 = vadd.f32 %v444_v58, %v441_v3  ;;  %v470_v13 = vmul.f32 %v469_v10, %v1163_v41  ;;  %v473_v14 = vstv %s1237_s17  ;;  %s837_s26 = sshll.u32 %s923_s12, 4  ;;  %s838_s26 = int_to_ptr.vmem [resolvable:$false] %s837_s26 }
  0x79   : > { %v381_v15 = vadd.f32 %v380_v55, %v378_v7  ;;  %v418_v18 = vadd.f32 %v417_v56, %v415_v8  ;;  %v467_v17 = vadd.f32 %v466_v9, %v463_v5  ;;  %v474_v19 = vmul.f32 %v473_v14, %v1173_v52  ;;  %p835_p7 = pnand %p834_p3, %p989_p8  ;;  %s839_s30 = scalar_lea.vmem %s838_s26, 1024 }
  0x7a   : > { %v449_v20 = vadd.f32 %v448_v4, %v445_v11  ;;  %v477_v22 = vstv %s1240_s6  ;;  %v481_v23 = vstv %s1245_s8  ;;  %p840_p12 = scmp.lt.s32.totalorder %s1271_s5, %s838_s26  ;;  %p841_p13 = scmp.lt.s32.totalorder %s839_s30, %s833_s29 }
  0x7b   : > { %v382_v24 = vmax.f32 %v381_v15, -1.0  ;;  %v419_v30 = vmax.f32 %v418_v18, -1.0  ;;  %v471_v25 = vadd.f32 %v470_v13, %v467_v17  ;;  %v478_v26 = vmul.f32 %v477_v22, %v1185_v62  ;;  %p836_p9 = pneg %p835_p7 }
  0x7c   : > { %v453_v27 = vadd.f32 %v452_v12, %v449_v20  ;;  %v485_v41 = vstv %s1249_s3  ;;  %v482_v32 = vmul.f32 %v481_v23, %v1199_v16  ;;  %v489_v52 = vstv %s1254_s16  ;;  %p842_p2 = por %p841_p13, %p840_p12 }
  0x7d   : > { %v383_v28 = vmin.f32 %v382_v24, 2.0  ;;  %v420_v29 = vmin.f32 %v419_v30, 2.0  ;;  %v475_v31 = vadd.f32 %v474_v19, %v471_v25  ;;  %v486_v34 = vmul.f32 %v485_v41, %v1219_v35 }
  0x7e   : > { %v456_v0 = vadd.f32 %v455_v21, %v453_v27  ;;  %v490_v1 = vmul.f32 %v489_v52, %v347_v50  ;;  %v493_v2 = vstv %s690_s22  ;;  %p843_p5 = pnand %p842_p2, %p836_p9 }
  0x7f   : > { %384 = vst [vmem:[%s190_s24] sm:$0xff] %v383_v28  ;;  %671 = vst [vmem:[%s190_s24 + $0x8] sm:$0xff] %v420_v29  ;;  %v479_v33 = vadd.f32 %v478_v26, %v475_v31 }
  0x80   : > { %v457_v36 = vmax.f32 %v456_v0, -1.0 }
  0x81   : > { %v483_v62 = vadd.f32 %v482_v32, %v479_v33 }
  0x82   : > { %v458_v37 = vmin.f32 %v457_v36, 2.0 }
  0x83   : > { %v487_v38 = vadd.f32 %v486_v34, %v483_v62 }
  0x84   : > { %681 = vst [vmem:[%s190_s24 + $0x10] sm:$0xff] %v458_v37 }
  0x85   : > { %v491_v39 = vadd.f32 %v490_v1, %v487_v38 }
  0x87   : > { %v494_v16 = vadd.f32 %v493_v2, %v491_v39 }
  0x89   : > { %v495_v40 = vmax.f32 %v494_v16, -1.0 }
  0x8b   : > { %v496_v35 = vmin.f32 %v495_v40, 2.0 }
  0x8d   : > { %691 = vst [vmem:[%s190_s24 + $0x18] sm:$0xff] %v496_v35 }
  0x8e   : > { %846 = shalt.err (!%p843_p5)
}
  0x8f   : > { %s847_s17 = scalar_lea.hbm %s1276_s7, 512  ;;  %s851_s3 = scalar_lea.hbm %s1326_s2, 1024 }
  0x90   : > { %p848_p10 = scmp.ne.s32.totalorder %s1276_s7, %s847_s17  ;;  %p852_p0 = scmp.lt.s32.totalorder %s1276_s7, %s1326_s2 }
  0x91   : > { %p853_p4 = scmp.lt.s32.totalorder %s851_s3, %s847_s17 }
  0x92   : > { %p849_p11 = pnand %p848_p10, %p989_p8 }
  0x93   : > { %p854_p6 = por %p853_p4, %p852_p0 }
  0x94   : > { %p850_p1 = pneg %p849_p11 }
  0x96   : > { %p855_p3 = pnand %p854_p6, %p850_p1 }
  0x98   : > { %858 = shalt.err (!%p855_p3)
}
  0x99   : > { %s924_s22 = smov 128   ;;  %s925_s24 = smov 8  }
  0x9a   : > { %707 = dma.vmem_to_hbm [thread:$0]  (%p989_p8), %s1271_s5, 512, %s1276_s7, %s500_s28, %s924_s22, %s924_s22, %s925_s24  }
  0x9b PF: > { %s529_s19 = sand.u32 1, %s897_s9   ;;  %p1333_p7 = scmp.ne.s32.totalorder %s1330_s21, 0 }
  0x9c   : > { %p1334_p9 = scmp.ge.s32.totalorder %s917_s14, 2  ;;  %s530_s27 = scalar_lea.sflag [#allocation4], %s529_s19 }
  0x9e   : > { %p718_p12 = pnand %p1334_p9, %p1333_p7 }
  0xa0   : > { %p719_p13 = pneg %p718_p12 }
  0xa2   : > { %892 = dma.done.wait (%p719_p13), %s530_s27, 512  }
  0xa3   : > { %894 = vsyncadd (%p719_p13), %s530_s27, 4294966784  ;;  %s19_s14 = sadd.s32 1, %s917_s14   ;;  %s1335_s9 = smov %s901_s10 }
  0xa4   : > { %p16_p2 = scmp.ge.s32.totalorder %s19_s14, 4   ;;  %s1336_s10 = smov %s905_s11 }
  0xa5   : > { %s1337_s11 = smov %s1029_s15  ;;  %s1338_s12 = smov %s913_s13 }
  0xa6   : > { %s1339_s13 = smov %s1341_s25  ;;  %18 = sbr.rel (!%p16_p2) target bundleno = 7 (0x7), region = 83 }
  0xab   :  { %535 = vsyncpa [#allocation3], 1 }
  0xac   :  { %537 = vsyncpa [#allocation3 + $0x1], 1 }
  0xad   :  { %538 = vsyncpa [#allocation4], 1 }
  0xae   :  { %540 = vsyncpa [#allocation4 + $0x1], 1 }
  0xaf   :  { %541 = vsyncpa [#allocation5], 1 }
  0xb0   :  { %543 = vsyncpa [#allocation5 + $0x1], 1 }

</bundles_post_ra>
